<compile_context>
chip_gen: v6e
topology: v6e:2x2x1
jax: 0.10.0
libtpu: 0.0.40
codegen_flags: <defaults>
</compile_context>

<pallas_src>
import jax
import jax.numpy as jnp
from jax.experimental import pallas as pl

ACTIONS_DIM = 2
OBSERVATIONS_DIM = 4
HIDDEN = 32
LANE = 128                  # lane width for all padded feature dims
W_ROWS = 3 * HIDDEN         # bf16 slab rows: 32 (layer 2) + 64 (layer 3)


def _net_kernel(x_ref, w_ref, wb_ref, out_ref):
    """x_ref:  (B, 4)    f32  observations (natural shape, no padding)
       w_ref:  (96, 128) bf16 packed weights: rows 0:32 = [wa1 | wv1],
                              rows 32:96 = layer-3 block (value folded in)
       wb_ref: (8, 128)  f32  rows 0:4 = trunk w1, row 4 = b1,
                              row 5 = [ba1 | bv1], row 6 = fused layer-3 bias
       out_ref:(B, 128)  f32  lane-dense; lanes 0:2 hold the Q-values
    """
    x = x_ref[...]                                      # (B, 4) f32
    wb = wb_ref[...]                                    # (8, 128) f32

    # ---- Trunk Linear(4, 32) + ReLU: 4 broadcast-FMAs on the VPU, f32 -----
    acc = x[:, 0:1] * wb[0:1, :]
    for j in range(1, OBSERVATIONS_DIM):
        acc = acc + x[:, j : j + 1] * wb[j : j + 1, :]
    h = jnp.maximum(acc + wb[4:5, :], 0.0)              # (B,128); cols 32+ are 0

    # ---- Layer 2: fused head hidden [wa1 | wv1], K=32 bf16 MXU dot --------
    h2 = jnp.dot(h[:, 0:HIDDEN].astype(jnp.bfloat16), w_ref[0:HIDDEN, :],
                 preferred_element_type=jnp.float32)
    h2 = jnp.maximum(h2 + wb[5:6, :], 0.0)              # (B,128); cols 64+ are 0

    # ---- Layer 3: block-diag heads with value folded into action columns,
    #      K=64 bf16 MXU dot.  cols 0,1 = adv_i + val, col 2 = val ----------
    y = jnp.dot(h2[:, 0:2 * HIDDEN].astype(jnp.bfloat16),
                w_ref[HIDDEN:3 * HIDDEN, :],
                preferred_element_type=jnp.float32)
    y = y + wb[6:7, :]                                  # (B,128); cols 3+ are 0

    # ---- Dueling epilogue: mean over ALL advantage elements ---------------
    # lane weights [1, 1, -2, 0, ...]:  (adv0+val) + (adv1+val) - 2*val = adv0+adv1
    lane = jax.lax.broadcasted_iota(jnp.int32, (1, LANE), 1)
    lane_w = jnp.where(lane < ACTIONS_DIM, 1.0,
                       jnp.where(lane == ACTIONS_DIM, -2.0, 0.0))
    s = jnp.sum(y * lane_w, axis=1, keepdims=True)      # (B, 1) per-row adv sum
    mean = jnp.sum(s, axis=0, keepdims=True) * (
        1.0 / float(x.shape[0] * ACTIONS_DIM))          # (1, 1)

    # cols 0,1 already hold val + adv; subtract the global advantage mean.
    out_ref[...] = (y - mean).astype(out_ref.dtype)


def pack_params(params):
    """Pack PyTorch-layout ((in, out) transposed) params into two DMA slabs."""
    (w1, b1, wa1, ba1, wa2, ba2, wv1, bv1, wv2, bv2) = params
    H, A = HIDDEN, ACTIONS_DIM

    # f32 slab: trunk weights + every bias (one (8,128) tile).
    wb = jnp.zeros((8, LANE), jnp.float32)
    wb = wb.at[0:OBSERVATIONS_DIM, 0:H].set(w1)                 # trunk w1 rows
    wb = wb.at[4, 0:H].set(b1[0])                               # b1
    wb = wb.at[5, 0:H].set(ba1[0])                              # fused layer-2 bias
    wb = wb.at[5, H:2 * H].set(bv1[0])
    wb = wb.at[6, 0:A].set(ba2[0] + bv2[0, 0])                  # layer-3 bias, val folded
    wb = wb.at[6, A].set(bv2[0, 0])

    # bf16 slab: layer-2 (rows 0:32) and layer-3 (rows 32:96) weights.
    w = jnp.zeros((W_ROWS, LANE), jnp.float32)
    w = w.at[0:H, 0:H].set(wa1)                                 # [wa1 | wv1]
    w = w.at[0:H, H:2 * H].set(wv1)
    w = w.at[H:2 * H, 0:A].set(wa2)                             # adv-hidden rows
    w = w.at[2 * H:3 * H, 0:A].set(jnp.broadcast_to(wv2, (H, A)))  # val into adv cols
    w = w.at[2 * H:3 * H, A].set(wv2[:, 0])                     # val column
    return w.astype(jnp.bfloat16), wb


@jax.jit
def net_forward(x, packed):
    w_slab, wb_slab = packed
    B = x.shape[0]
    out = pl.pallas_call(
        _net_kernel,
        out_shape=jax.ShapeDtypeStruct((B, LANE), jnp.float32),
        grid=(),
        in_specs=[
            pl.BlockSpec((B, OBSERVATIONS_DIM), lambda: (0, 0)),  # x, natural shape
            pl.BlockSpec((W_ROWS, LANE), lambda: (0, 0)),         # bf16 weight slab
            pl.BlockSpec((8, LANE), lambda: (0, 0)),              # f32 trunk+bias slab
        ],
        out_specs=pl.BlockSpec((B, LANE), lambda: (0, 0)),        # lane-dense output
    )(x.astype(jnp.float32), w_slab, wb_slab)
    return out[:, :ACTIONS_DIM]


def init_params(key):
    """Deterministic synthetic parameters (PyTorch-style shapes, transposed)."""
    ks = jax.random.split(key, 10)

    def linear(kw, kb, fan_in, fan_out):
        bound = 1.0 / jnp.sqrt(fan_in)
        w = jax.random.uniform(kw, (fan_in, fan_out), jnp.float32, -bound, bound)
        b = jax.random.uniform(kb, (1, fan_out), jnp.float32, -bound, bound)
        return w, b

    w1, b1 = linear(ks[0], ks[1], OBSERVATIONS_DIM, HIDDEN)
    wa1, ba1 = linear(ks[2], ks[3], HIDDEN, HIDDEN)
    wa2, ba2 = linear(ks[4], ks[5], HIDDEN, ACTIONS_DIM)
    wv1, bv1 = linear(ks[6], ks[7], HIDDEN, HIDDEN)
    wv2, bv2 = linear(ks[8], ks[9], HIDDEN, 1)
    return (w1, b1, wa1, ba1, wa2, ba2, wv1, bv1, wv2, bv2)


def _reference(x, params):
    (w1, b1, wa1, ba1, wa2, ba2, wv1, bv1, wv2, bv2) = params
    h = jnp.maximum(x @ w1 + b1, 0.0)
    ah = jnp.maximum(h @ wa1 + ba1, 0.0)
    adv = ah @ wa2 + ba2
    vh = jnp.maximum(h @ wv1 + bv1, 0.0)
    val = vh @ wv2 + bv2
    return val + adv - jnp.mean(adv)


if __name__ == "__main__":
    key = jax.random.PRNGKey(0)
    k_x, k_p = jax.random.split(key)

    B = 8  # small batch of observations
    x = jax.random.normal(k_x, (B, OBSERVATIONS_DIM), jnp.float32)
    params = init_params(k_p)
    packed = pack_params(params)

    out = net_forward(x, packed)
    out = jax.block_until_ready(out)

    ref = _reference(x, params)
    assert out.shape == (B, ACTIONS_DIM)
    # layers 2/3 use bf16 MXU operands (f32 accumulation) -> loosened tolerance.
    assert jnp.allclose(out, ref, atol=3e-2, rtol=3e-2), (out, ref)

    print("KERNEL_OK")
</pallas_src>

<mosaic_0001>
module attributes {stable_mosaic.version = 11 : i64} {
  func.func @_net_kernel(%arg0: memref<8x4xf32, #tpu.memory_space<vmem>>, %arg1: memref<96x128xbf16, #tpu.memory_space<vmem>>, %arg2: memref<8x128xf32, #tpu.memory_space<vmem>>, %arg3: memref<8x128xf32, #tpu.memory_space<vmem>>) attributes {dimension_semantics = [], scalar_prefetch = 0 : i64, scratch_operands = 0 : i64, tpu.core_type = #tpu.core_type<tc>} {
    %c0 = arith.constant 0 : index
    %c0_0 = arith.constant 0 : index
    %0 = vector.load %arg0[%c0, %c0_0] : memref<8x4xf32, #tpu.memory_space<vmem>>, vector<8x4xf32>
    %c0_1 = arith.constant 0 : index
    %c0_2 = arith.constant 0 : index
    %1 = vector.load %arg2[%c0_1, %c0_2] : memref<8x128xf32, #tpu.memory_space<vmem>>, vector<8x128xf32>
    %2 = vector.extract_strided_slice %0 {offsets = [0, 0], sizes = [8, 1], strides = [1, 1]} : vector<8x4xf32> to vector<8x1xf32>
    %3 = vector.extract_strided_slice %1 {offsets = [0, 0], sizes = [1, 128], strides = [1, 1]} : vector<8x128xf32> to vector<1x128xf32>
    %4 = vector.broadcast %2 : vector<8x1xf32> to vector<8x128xf32>
    %5 = vector.broadcast %3 : vector<1x128xf32> to vector<8x128xf32>
    %6 = arith.mulf %4, %5 : vector<8x128xf32>
    %7 = vector.extract_strided_slice %0 {offsets = [0, 1], sizes = [8, 1], strides = [1, 1]} : vector<8x4xf32> to vector<8x1xf32>
    %8 = vector.extract_strided_slice %1 {offsets = [1, 0], sizes = [1, 128], strides = [1, 1]} : vector<8x128xf32> to vector<1x128xf32>
    %9 = vector.broadcast %7 : vector<8x1xf32> to vector<8x128xf32>
    %10 = vector.broadcast %8 : vector<1x128xf32> to vector<8x128xf32>
    %11 = arith.mulf %9, %10 : vector<8x128xf32>
    %12 = arith.addf %6, %11 : vector<8x128xf32>
    %13 = vector.extract_strided_slice %0 {offsets = [0, 2], sizes = [8, 1], strides = [1, 1]} : vector<8x4xf32> to vector<8x1xf32>
    %14 = vector.extract_strided_slice %1 {offsets = [2, 0], sizes = [1, 128], strides = [1, 1]} : vector<8x128xf32> to vector<1x128xf32>
    %15 = vector.broadcast %13 : vector<8x1xf32> to vector<8x128xf32>
    %16 = vector.broadcast %14 : vector<1x128xf32> to vector<8x128xf32>
    %17 = arith.mulf %15, %16 : vector<8x128xf32>
    %18 = arith.addf %12, %17 : vector<8x128xf32>
    %19 = vector.extract_strided_slice %0 {offsets = [0, 3], sizes = [8, 1], strides = [1, 1]} : vector<8x4xf32> to vector<8x1xf32>
    %20 = vector.extract_strided_slice %1 {offsets = [3, 0], sizes = [1, 128], strides = [1, 1]} : vector<8x128xf32> to vector<1x128xf32>
    %21 = vector.broadcast %19 : vector<8x1xf32> to vector<8x128xf32>
    %22 = vector.broadcast %20 : vector<1x128xf32> to vector<8x128xf32>
    %23 = arith.mulf %21, %22 : vector<8x128xf32>
    %24 = arith.addf %18, %23 : vector<8x128xf32>
    %25 = vector.extract_strided_slice %1 {offsets = [4, 0], sizes = [1, 128], strides = [1, 1]} : vector<8x128xf32> to vector<1x128xf32>
    %26 = vector.broadcast %25 : vector<1x128xf32> to vector<8x128xf32>
    %27 = arith.addf %24, %26 : vector<8x128xf32>
    %cst = arith.constant 0.000000e+00 : f32
    %28 = vector.broadcast %cst : f32 to vector<8x128xf32>
    %29 = arith.maximumf %27, %28 : vector<8x128xf32>
    %30 = vector.extract_strided_slice %29 {offsets = [0, 0], sizes = [8, 32], strides = [1, 1]} : vector<8x128xf32> to vector<8x32xf32>
    %31 = arith.truncf %30 : vector<8x32xf32> to vector<8x32xbf16>
    %c0_3 = arith.constant 0 : index
    %c0_4 = arith.constant 0 : index
    %32 = vector.load %arg1[%c0_3, %c0_4] : memref<96x128xbf16, #tpu.memory_space<vmem>>, vector<32x128xbf16>
    %cst_5 = arith.constant dense<0.000000e+00> : vector<8x128xf32>
    %33 = tpu.matmul %31, %32, %cst_5 {dimension_numbers = #tpu.dot_dimension_numbers<[1], [0], [0], [1], [0, 0, 1, 1], [], []>} : vector<8x32xbf16>, vector<32x128xbf16>, vector<8x128xf32> -> vector<8x128xf32>
    %34 = vector.extract_strided_slice %1 {offsets = [5, 0], sizes = [1, 128], strides = [1, 1]} : vector<8x128xf32> to vector<1x128xf32>
    %35 = vector.broadcast %34 : vector<1x128xf32> to vector<8x128xf32>
    %36 = arith.addf %33, %35 : vector<8x128xf32>
    %cst_6 = arith.constant 0.000000e+00 : f32
    %37 = vector.broadcast %cst_6 : f32 to vector<8x128xf32>
    %38 = arith.maximumf %36, %37 : vector<8x128xf32>
    %39 = vector.extract_strided_slice %38 {offsets = [0, 0], sizes = [8, 64], strides = [1, 1]} : vector<8x128xf32> to vector<8x64xf32>
    %40 = arith.truncf %39 : vector<8x64xf32> to vector<8x64xbf16>
    %c32 = arith.constant 32 : index
    %c0_7 = arith.constant 0 : index
    %41 = vector.load %arg1[%c32, %c0_7] : memref<96x128xbf16, #tpu.memory_space<vmem>>, vector<64x128xbf16>
    %cst_8 = arith.constant dense<0.000000e+00> : vector<8x128xf32>
    %42 = tpu.matmul %40, %41, %cst_8 {dimension_numbers = #tpu.dot_dimension_numbers<[1], [0], [0], [1], [0, 0, 1, 1], [], []>} : vector<8x64xbf16>, vector<64x128xbf16>, vector<8x128xf32> -> vector<8x128xf32>
    %43 = vector.extract_strided_slice %1 {offsets = [6, 0], sizes = [1, 128], strides = [1, 1]} : vector<8x128xf32> to vector<1x128xf32>
    %44 = vector.broadcast %43 : vector<1x128xf32> to vector<8x128xf32>
    %45 = arith.addf %42, %44 : vector<8x128xf32>
    %46 = tpu.iota {dimensions = array<i32: 1>} : vector<1x128xi32>
    %c2_i32 = arith.constant 2 : i32
    %47 = vector.broadcast %c2_i32 : i32 to vector<1x128xi32>
    %48 = arith.cmpi slt, %46, %47 : vector<1x128xi32>
    %c2_i32_9 = arith.constant 2 : i32
    %49 = vector.broadcast %c2_i32_9 : i32 to vector<1x128xi32>
    %50 = arith.cmpi eq, %46, %49 : vector<1x128xi32>
    %cst_10 = arith.constant -2.000000e+00 : f32
    %cst_11 = arith.constant 0.000000e+00 : f32
    %51 = vector.broadcast %cst_10 : f32 to vector<1x128xf32>
    %52 = vector.broadcast %cst_11 : f32 to vector<1x128xf32>
    %53 = arith.select %50, %51, %52 : vector<1x128xi1>, vector<1x128xf32>
    %cst_12 = arith.constant 1.000000e+00 : f32
    %54 = vector.broadcast %cst_12 : f32 to vector<1x128xf32>
    %55 = arith.select %48, %54, %53 : vector<1x128xi1>, vector<1x128xf32>
    %56 = vector.broadcast %55 : vector<1x128xf32> to vector<8x128xf32>
    %57 = arith.mulf %45, %56 : vector<8x128xf32>
    %cst_13 = arith.constant dense<0.000000e+00> : vector<8xf32>
    %58 = vector.multi_reduction <add>, %57, %cst_13 [1] : vector<8x128xf32> to vector<8xf32>
    %59 = vector.shape_cast %58 : vector<8xf32> to vector<8x1xf32>
    %cst_14 = arith.constant dense<0.000000e+00> : vector<1xf32>
    %60 = vector.multi_reduction <add>, %59, %cst_14 [0] : vector<8x1xf32> to vector<1xf32>
    %61 = vector.shape_cast %60 : vector<1xf32> to vector<1x1xf32>
    %cst_15 = arith.constant 6.250000e-02 : f32
    %62 = vector.broadcast %cst_15 : f32 to vector<1x1xf32>
    %63 = arith.mulf %61, %62 : vector<1x1xf32>
    %64 = vector.broadcast %63 : vector<1x1xf32> to vector<8x128xf32>
    %65 = arith.subf %45, %64 : vector<8x128xf32>
    %c0_16 = arith.constant 0 : index
    %c0_17 = arith.constant 0 : index
    %66 = vector.load %arg3[%c0_16, %c0_17] : memref<8x128xf32, #tpu.memory_space<vmem>>, vector<8x128xf32>
    tpu.vector_store %arg3[%c0_16, %c0_17], %65 {strides = array<i32>} : memref<8x128xf32, #tpu.memory_space<vmem>>, vector<8x128xf32>,
    return
  }
}

</mosaic_0001>

<bundles_post_ra>
// kernel: net_forward.1
= control target key start
LH: loop header
LB: loop body
LE: loop exit
PB: predicated region body
PF: predicated region fallthrough
CT: control target
= control target key end

     0   :  { %8 = vsyncpa [#allocation3], 0  ;;  %s325_s12 = smov [#allocation2]   ;;  %s375_s0 = inlined_call_operand.vmem [shape: f32[8,4], index: 0, kind: input, shape index: {}]   ;;  %s376_s1 = inlined_call_operand.hbm [shape: bf16[96,128], index: 1, kind: input, shape index: {}]   ;;  %s377_s2 = inlined_call_operand.vmem [shape: f32[8,128], index: 2, kind: input, shape index: {}]   ;;  %s378_s3 = inlined_call_operand.vmem [shape: f32[8,128], index: 3, kind: output, shape index: {}]  }
   0x1   :  { %s16_s13 = sshll.u32 %s325_s12, 4  ;;  %s17_s13 = int_to_ptr.vmem [resolvable:$true] %s16_s13 }
   0x2   :  { %s311_s14 = scalar_lea.vmem %s17_s13, 768  ;;  %p316_p1 = scmp.lt.s32.totalorder %s17_s13, %s17_s13 }
   0x3   :  { %p312_p0 = scmp.ne.s32.totalorder %s17_s13, %s311_s14  ;;  %p317_p2 = scmp.lt.s32.totalorder %s311_s14, %s311_s14 }
   0x5   :  { %p318_p3 = por %p317_p2, %p316_p1 }
   0x7   :  { %p319_p4 = pnand %p318_p3, %p312_p0 }
   0x9   :  { %322 = shalt.err (!%p319_p4)
}
   0xa   :  { %s326_s15 = smov 64   ;;  %s327_s16 = smov 4  }
   0xb   :  { %22 = dma.hbm_to_vmem [thread:$0]  %s376_s1, 768, %s17_s13, [#allocation3], %s326_s15, %s326_s15, %s327_s16  }
   0xc   :  { %323 = dma.done.wait [#allocation3], 768  }
   0xd   :  { %324 = vsyncadd [#allocation3], 4294966528  ;;  %v328_v0 = vmov 0   ;;  %v329_v1 = vmov 2   ;;  %v29_v2 = vld [vmem:[%s375_s0] sm:$0xff]  ;;  %v330_v3 = vmov 1   ;;  %v36_v10 = vlaneseq }
   0xe   :  { %292 = vset.pattern.permute.xlu0 %v328_v0  ;;  %294 = vset.pattern.permute.xlu1 %v329_v1  ;;  %v331_v4 = vmov 3   ;;  %v297_v5 = vld [vmem:[#allocation2 + $0x8] sm:$0xff]   ;;  %v332_v6 = vmov 0.0   ;;  %v298_v7 = vld [vmem:[#allocation2] sm:$0xff]   ;;  %vm333_vm0 = vmmov 0   ;;  %vm98_vm1 = vcmask 261120  }
   0xf   :  { %33 = vperm.xlu0 %292, %v29_v2   ;;  %52 = vperm.xlu1 %294, %v29_v2   ;;  %v299_v8 = vld [vmem:[#allocation2 + $0x28] sm:$0xff]   ;;  %v300_v9 = vld [vmem:[#allocation2 + $0x20] sm:$0xff]   ;;  %v37_v11 = vshrl.u32 %v36_v10, 7  ;;  %v301_v37 = vld [vmem:[#allocation2 + $0x18] sm:$0xff]   ;;  %vm180_vm2 = vcmask 523264   ;;  %v225_v48 = vand.u32 127, %v36_v10 }
  0x10   :  { %263 = vmatprep.subr.bf16.mxu0 %v332_v6  ;;  %271 = vmatprep.subr.bf16.mxu1 %v332_v6  ;;  %v30_v14 = vld [vmem:[%s377_s2] sm:$0xff]  ;;  %v302_v38 = vld [vmem:[#allocation2 + $0x10] sm:$0xff]  }
  0x11   :  { %264 = vmatpush3.bf16.msra.mxu0 %v297_v5  ;;  %267 = vmatprep.mubr.msk.bf16.mxu0 %vm333_vm0, %v332_v6  ;;  %v38_v12 = vsub.s32 0, %v37_v11  ;;  %v47_v13 = vsub.s32 1, %v37_v11  ;;  %v57_v16 = vsub.s32 2, %v37_v11  ;;  %v67_v18 = vsub.s32 3, %v37_v11 }
  0x12   :  { %265 = vmatprep.subr.bf16.mxu0 %v332_v6  ;;  %279 = vmatprep.mubr.msk.bf16.mxu1 %vm333_vm0, %v332_v6  ;;  %v73_v27 = vsub.s32 4, %v37_v11  ;;  %v84_v39 = vsub.s32 5, %v37_v11  ;;  %v154_v49 = vsub.s32 6, %v37_v11  ;;  %vm227_vm3 = vcmp.eq.s32.totalorder %v225_v48, 2 }
  0x13   :  { %293 = vset.pattern.permute.xlu0 %v330_v3  ;;  %295 = vset.pattern.permute.xlu1 %v331_v4  ;;  %v39_v19 = vrot.slane %v30_v14, %v38_v12  ;;  %v48_v20 = vrot.slane %v30_v14, %v47_v13  ;;  %v58_v21 = vrot.slane %v30_v14, %v57_v16  ;;  %vm226_vm4 = vcmp.lt.s32.totalorder %v225_v48, 2 }
  0x14   :  { %42 = vperm.xlu0 %293, %v29_v2   ;;  %62 = vperm.xlu1 %295, %v29_v2   ;;  %v68_v22 = vrot.slane %v30_v14, %v67_v18  ;;  %v74_v31 = vrot.slane %v30_v14, %v73_v27  ;;  %v85_v40 = vrot.slane %v30_v14, %v84_v39  ;;  %v228_v51 = vsel %vm227_vm3, -2.0, %v332_v6 }
  0x15   :  { %266 = vmatpush3.bf16.msra.mxu0 %v298_v7  ;;  %272 = vmatpush3.bf16.msra.mxu1 %v299_v8  ;;  %v155_v50 = vrot.slane %v30_v14, %v154_v49  ;;  %v229_v53 = vsel %vm226_vm4, 1.0, %v228_v51 }
  0x16   :  { %273 = vmatprep.subr.bf16.mxu1 %v332_v6 }
  0x18   :  { %296 = vset.pattern.permute.xlu0 %v331_v4 }
  0x19   :  { %274 = vmatpush3.bf16.msra.mxu1 %v300_v9 }
  0x1a   :  { %275 = vmatprep.subr.bf16.mxu1 %v332_v6 }
  0x1d   :  { %276 = vmatpush3.bf16.msra.mxu1 %v301_v37 }
  0x1e   :  { %277 = vmatprep.subr.bf16.mxu1 %v332_v6 }
  0x21   :  { %278 = vmatpush3.bf16.msra.mxu1 %v302_v38 }
  0x8a   :  { %v34_v15 = vpop.permute.xlu0 %33  ;;  %v53_v17 = vpop.permute.xlu1 %52 }
  0x8b   :  { %v40_v25 = vmul.f32 %v39_v19, %v34_v15  ;;  %v59_v28 = vmul.f32 %v58_v21, %v53_v17 }
  0x8f   :  { %v43_v23 = vpop.permute.xlu0 %42  ;;  %v63_v24 = vpop.permute.xlu1 %62 }
  0x90   :  { %v49_v26 = vmul.f32 %v48_v20, %v43_v23  ;;  %v69_v30 = vmul.f32 %v68_v22, %v63_v24 }
  0x92   :  { %v50_v29 = vadd.f32 %v49_v26, %v40_v25 }
  0x94   :  { %v60_v32 = vadd.f32 %v59_v28, %v50_v29 }
  0x96   :  { %v70_v33 = vadd.f32 %v69_v30, %v60_v32 }
  0x98   :  { %v75_v34 = vadd.f32 %v74_v31, %v70_v33 }
  0x9a   :  { %v76_v35 = vmax.f32 %v75_v34, 0.0 }
  0x9c   :  { %v77_v36 = vpack.c.bf16 %v76_v35, %v76_v35 }
  0x9e   :  { %268 = vmatmul.mubr.msk.bf16.vlgmr.msra.gmra.mxu0 %vm98_vm1, %v77_v36 }
 0x15e   :  { %v136_v41 = vpop.f32.mrf.mxu0 }
 0x15f   :  { %v137_v42 = vadd.f32 %v136_v41, %v85_v40 }
 0x160   :  { %v269_v43 = vpop.f32.mrf.mxu0 }
 0x161   :  { %v142_v44 = vmax.f32 %v137_v42, 0.0 }
 0x162   :  { %v139_v45 = vpop.f32.mrf.mxu0 }
 0x163   :  { %v143_v46 = vpack.c.bf16 %v142_v44, %v142_v44 }
 0x164   :  { %v270_v47 = vpop.f32.mrf.mxu0 }
 0x165   :  { %280 = vmatmul.mubr.msk.bf16.vlgmr.msra.gmra.mxu1 %vm180_vm2, %v143_v46 }
 0x225   :  { %v218_v52 = vpop.f32.mrf.mxu1 }
 0x226   :  { %v219_v54 = vadd.f32 %v218_v52, %v155_v50 }
 0x227   :  { %v281_v55 = vpop.f32.mrf.mxu1 }
 0x228   :  { %v230_v56 = vmul.f32 %v229_v53, %v219_v54 }
 0x229   :  { %v221_v57 = vpop.f32.mrf.mxu1 }
 0x22a   :  { %231 = vadd.xlane.f32.xlu1 %v230_v56 }
 0x22b   :  { %v282_v58 = vpop.f32.mrf.mxu1 }
 0x2b3   :  { %v232_v59 = vpop.xlane.xlu1 %231 }
 0x2b4   :  { %v233_v60 = vrot.slane %v232_v59, 4 }
 0x2b6   :  { %v234_v61 = vadd.f32 %v233_v60, %v232_v59 }
 0x2b8   :  { %v235_v62 = vrot.slane %v234_v61, 2 }
 0x2ba   :  { %v236_v63 = vadd.f32 %v235_v62, %v234_v61 }
 0x2bc   :  { %v237_v0 = vrot.slane %v236_v63, 1 }
 0x2be   :  { %v238_v1 = vadd.f32 %v237_v0, %v236_v63 }
 0x2c0   :  { %v239_v2 = vmul.f32 0.0625, %v238_v1 }
 0x2c2   :  { %v240_v3 = vsub.f32 %v219_v54, %v239_v2 }
 0x2c4   :  { %241 = vst [vmem:[%s378_s3] sm:$0xff] %v240_v3 }
 0x2c5   :  { %246 = vsyncpa [#allocation3], 1 }

</bundles_post_ra>
